<compile_context>
chip_gen: v7x
topology: tpu7x:2x2x1
jax: 0.10.0
libtpu: 0.0.40
codegen_flags: <defaults>
</compile_context>

<pallas_src>
import functools
import math

import jax
import jax.numpy as jnp
from jax import lax
from jax.experimental import pallas as pl
from jax.experimental.pallas import tpu as pltpu


# --------------------------------------------------------------------------
# Kernel 1: K / V projection (bias-free, see header) — one pass over tokens.
# --------------------------------------------------------------------------
def _kv_proj_kernel(k_ref, v_ref, wk_ref, wv_ref, kp_ref, vp_ref):
    kp_ref[...] = jnp.dot(k_ref[...], wk_ref[...],
                          preferred_element_type=jnp.float32).astype(kp_ref.dtype)
    vp_ref[...] = jnp.dot(v_ref[...], wv_ref[...],
                          preferred_element_type=jnp.float32).astype(vp_ref.dtype)


# --------------------------------------------------------------------------
# Kernel 2: flash attention over projected K/V + LayerNorm + folded projection.
# --------------------------------------------------------------------------
def _moh_flash_kernel(q_ref, kp_ref, vp_ref,
                      wq_ref, bq_ref, bv_ref,
                      weff_ref, beff_ref,
                      out_ref,
                      q_scr, m_scr, l_scr, acc_scr,
                      *, eps):
    """One (batch, q_tile) output block; kv tiles run on the innermost grid axis."""
    ki = pl.program_id(2)
    nk = pl.num_programs(2)

    @pl.when(ki == 0)
    def _init():
        # Project the Q tile once per (b, q_tile); 1/sqrt(dim_qk) is already
        # folded into Wq/bq by the wrapper.
        q_proj = jnp.dot(q_ref[...], wq_ref[...],
                         preferred_element_type=jnp.float32) + bq_ref[...]
        q_scr[...] = q_proj.astype(q_scr.dtype)
        m_scr[...] = jnp.full(m_scr.shape, -jnp.inf, dtype=m_scr.dtype)
        l_scr[...] = jnp.zeros(l_scr.shape, dtype=l_scr.dtype)
        acc_scr[...] = jnp.zeros(acc_scr.shape, dtype=acc_scr.dtype)

    # scores = Q K^T: contract the last dims of both operands directly on the
    # MXU (no explicit transpose).  Shape (TQ, TKV), f32.  K bias is exactly
    # irrelevant here (constant shift along the softmax axis).
    scores = lax.dot_general(
        q_scr[...], kp_ref[...],
        dimension_numbers=(((1,), (1,)), ((), ())),
        preferred_element_type=jnp.float32)

    # TODO(synk): mask=None path only; an additive mask tile could be added to
    # `scores` here analogously to the reference module's optional mask.

    # Online softmax update (f32).
    m_prev = m_scr[...]
    m_new = jnp.maximum(m_prev, jnp.max(scores, axis=-1, keepdims=True))
    alpha = jnp.exp(m_prev - m_new)
    p = jnp.exp(scores - m_new)
    l_scr[...] = alpha * l_scr[...] + jnp.sum(p, axis=-1, keepdims=True)
    acc_scr[...] = alpha * acc_scr[...] + jnp.dot(
        p.astype(vp_ref.dtype), vp_ref[...],
        preferred_element_type=jnp.float32)
    m_scr[...] = m_new

    @pl.when(ki == nk - 1)
    def _finalize():
        # Softmax rows sum to 1, so the V bias is just added once here.
        head_out = (acc_scr[...] * pl.reciprocal(l_scr[...], approx=True)
                    + bv_ref[...])
        # Single shared-head output; the n_reps RepeatParallel copies are
        # identical, so LayerNorm stats over dim_qk equal stats over n*dim_qk.
        mu = jnp.mean(head_out, axis=-1, keepdims=True)
        var = jnp.mean(jnp.square(head_out - mu), axis=-1, keepdims=True)
        xn = (head_out - mu) * lax.rsqrt(var + eps)
        # Folded (LN affine + repeat-concat + Linear(n*dim_qk, dim_in)).
        out = jnp.dot(xn.astype(weff_ref.dtype), weff_ref[...],
                      preferred_element_type=jnp.float32) + beff_ref[...]
        out_ref[...] = out.astype(out_ref.dtype)


def _pick_tile(s, target):
    """Largest convenient tile that divides s (falls back to the full extent)."""
    if s <= target:
        return s
    for t in (target, 512, 256, 128, 64, 32, 16, 8):
        if t <= target and s % t == 0:
            return t
    return s


def mixture_of_heads_forward(query, key, value, params, *, n_reps, eps=1e-5,
                             return_att=True, compute_dtype=jnp.bfloat16,
                             q_tile=256, kv_tile=512, proj_tile=512):
    """Pallas implementation of MixtureOfHeads.forward (mask=None)."""
    B, S, dim_in = query.shape
    dim_qk = params["wq"].shape[1]
    f32 = jnp.float32

    # ---- One-time parameter folding (outside the kernels) ------------------
    scale = 1.0 / math.sqrt(dim_qk)
    wq = (params["wq"].astype(f32) * scale).astype(compute_dtype)
    bq = params["bq"].astype(f32) * scale
    wk = params["wk"].astype(compute_dtype)          # bk dropped (softmax-invariant)
    wv = params["wv"].astype(compute_dtype)
    bv = params["bv"].astype(f32).reshape(1, dim_qk)  # applied once at finalize
    gamma = params["gamma"].astype(f32).reshape(n_reps, dim_qk)
    wp = params["wp"].astype(f32).reshape(n_reps, dim_qk, dim_in)
    w_eff = jnp.einsum("nd,ndi->di", gamma, wp).astype(compute_dtype)
    b_eff = (params["bp"].astype(f32).reshape(1, dim_in)
             + params["beta"].astype(f32).reshape(1, -1) @ params["wp"].astype(f32))

    qc = query.astype(compute_dtype)
    kc = key.astype(compute_dtype)
    vc = value.astype(compute_dtype)

    # ---- Pass 1: project K and V once per token (no bias needed) -----------
    TS = _pick_tile(S, proj_tile)
    k_proj, v_proj = pl.pallas_call(
        _kv_proj_kernel,
        out_shape=(jax.ShapeDtypeStruct((B, S, dim_qk), compute_dtype),
                   jax.ShapeDtypeStruct((B, S, dim_qk), compute_dtype)),
        grid=(B, S // TS),
        in_specs=[
            pl.BlockSpec((None, TS, dim_in), lambda b, si: (b, si, 0)),   # k
            pl.BlockSpec((None, TS, dim_in), lambda b, si: (b, si, 0)),   # v
            pl.BlockSpec((dim_in, dim_qk), lambda b, si: (0, 0)),         # Wk
            pl.BlockSpec((dim_in, dim_qk), lambda b, si: (0, 0)),         # Wv
        ],
        out_specs=(pl.BlockSpec((None, TS, dim_qk), lambda b, si: (b, si, 0)),
                   pl.BlockSpec((None, TS, dim_qk), lambda b, si: (b, si, 0))),
        compiler_params=pltpu.CompilerParams(
            dimension_semantics=("parallel", "parallel")),
    )(kc, vc, wk, wv)

    # ---- Pass 2: flash attention + LayerNorm + folded output projection ----
    TQ = _pick_tile(S, q_tile)
    TKV = _pick_tile(S, kv_tile)
    grid = (B, S // TQ, S // TKV)

    def const2d(shape):
        # Constant index map: Pallas keeps the block resident (no re-DMA).
        return pl.BlockSpec(shape, lambda b, qi, ki: (0, 0))

    kernel = functools.partial(_moh_flash_kernel, eps=eps)

    out = pl.pallas_call(
        kernel,
        out_shape=jax.ShapeDtypeStruct((B, S, dim_in), query.dtype),
        grid=grid,
        in_specs=[
            pl.BlockSpec((None, TQ, dim_in), lambda b, qi, ki: (b, qi, 0)),   # q (raw)
            pl.BlockSpec((None, TKV, dim_qk), lambda b, qi, ki: (b, ki, 0)),  # K proj
            pl.BlockSpec((None, TKV, dim_qk), lambda b, qi, ki: (b, ki, 0)),  # V proj
            const2d((dim_in, dim_qk)), const2d((1, dim_qk)),   # Wq, bq (scaled)
            const2d((1, dim_qk)),                              # bv
            const2d((dim_qk, dim_in)), const2d((1, dim_in)),   # W_eff, b_eff
        ],
        out_specs=pl.BlockSpec((None, TQ, dim_in), lambda b, qi, ki: (b, qi, 0)),
        scratch_shapes=[
            pltpu.VMEM((TQ, dim_qk), compute_dtype),   # projected Q tile
            pltpu.VMEM((TQ, 1), jnp.float32),          # running max
            pltpu.VMEM((TQ, 1), jnp.float32),          # running denom
            pltpu.VMEM((TQ, dim_qk), jnp.float32),     # output accumulator
        ],
        compiler_params=pltpu.CompilerParams(
            dimension_semantics=("parallel", "parallel", "arbitrary")),
    )(qc, k_proj, v_proj, wq, bq, bv, w_eff, b_eff)

    if return_att:
        return out, [None]
    return out


def _reference_forward(query, key, value, params, *, n_reps, eps=1e-5):
    """Pure-JAX f32 reference with the original (unfolded) semantics."""
    dim_qk = params["wq"].shape[1]
    Q = query @ params["wq"] + params["bq"]
    K = key @ params["wk"] + params["bk"]
    V = value @ params["wv"] + params["bv"]
    scores = jnp.einsum("bqd,bkd->bqk", Q, K) / math.sqrt(dim_qk)
    att = jax.nn.softmax(scores, axis=-1)
    head_out = jnp.einsum("bqk,bkd->bqd", att, V)
    ho = jnp.concatenate([head_out] * n_reps, axis=-1)
    mu = jnp.mean(ho, axis=-1, keepdims=True)
    var = jnp.mean(jnp.square(ho - mu), axis=-1, keepdims=True)
    xn = (ho - mu) / jnp.sqrt(var + eps)
    xn = xn * params["gamma"] + params["beta"]
    return xn @ params["wp"] + params["bp"]


def init_params(key, dim_in, dim_qk, n_reps, dtype=jnp.float32):
    """Deterministic synthetic parameter init (mimics nn.Linear / LayerNorm shapes).

    gamma/beta are perturbed away from (1, 0) so the LN-affine folding is
    actually exercised by the self-check.
    """
    ks = jax.random.split(key, 10)
    nd = n_reps * dim_qk
    s_in = 1.0 / math.sqrt(dim_in)
    s_nd = 1.0 / math.sqrt(nd)
    return {
        "wq": jax.random.uniform(ks[0], (dim_in, dim_qk), dtype, -s_in, s_in),
        "bq": jax.random.uniform(ks[1], (1, dim_qk), dtype, -s_in, s_in),
        "wk": jax.random.uniform(ks[2], (dim_in, dim_qk), dtype, -s_in, s_in),
        "bk": jax.random.uniform(ks[3], (1, dim_qk), dtype, -s_in, s_in),
        "wv": jax.random.uniform(ks[4], (dim_in, dim_qk), dtype, -s_in, s_in),
        "bv": jax.random.uniform(ks[5], (1, dim_qk), dtype, -s_in, s_in),
        "gamma": 1.0 + 0.2 * jax.random.uniform(ks[6], (1, nd), dtype, -1.0, 1.0),
        "beta": 0.1 * jax.random.uniform(ks[7], (1, nd), dtype, -1.0, 1.0),
        "wp": jax.random.uniform(ks[8], (nd, dim_in), dtype, -s_nd, s_nd),
        "bp": jax.random.uniform(ks[9], (1, dim_in), dtype, -s_nd, s_nd),
    }


if __name__ == "__main__":
    # Small shapes; tiles forced to 8 so the multi-tile online-softmax path
    # (2 x 2 q/kv tiles per batch) and projection tiling are actually exercised.
    B, S, dim_in, dim_qk, n_reps = 2, 16, 32, 16, 2

    root = jax.random.PRNGKey(0)
    kq, kk, kv, kp = jax.random.split(root, 4)
    query = jax.random.normal(kq, (B, S, dim_in), jnp.float32)
    key_ = jax.random.normal(kk, (B, S, dim_in), jnp.float32)
    value = jax.random.normal(kv, (B, S, dim_in), jnp.float32)
    params = init_params(kp, dim_in, dim_qk, n_reps)

    out, att_list = mixture_of_heads_forward(
        query, key_, value, params, n_reps=n_reps, return_att=True,
        q_tile=8, kv_tile=8, proj_tile=8)
    out = jax.block_until_ready(out)

    ref = _reference_forward(query, key_, value, params, n_reps=n_reps)
    assert out.shape == (B, S, dim_in)
    assert att_list == [None]
    # bf16 MXU operands + approx reciprocal => slightly looser tolerance than
    # a bit-exact f32 comparison.
    max_err = float(jnp.max(jnp.abs(out - ref)))
    assert jnp.allclose(out, ref, atol=5e-2, rtol=5e-2), (
        f"mismatch vs reference, max abs err {max_err:.3e}")

    print("KERNEL_OK")
</pallas_src>

<mosaic_0001>
module attributes {stable_mosaic.version = 11 : i64} {
  func.func @_kv_proj_kernel(%arg0: i32, %arg1: i32, %arg2: memref<1x8x32xbf16, #tpu.memory_space<vmem>>, %arg3: memref<1x8x32xbf16, #tpu.memory_space<vmem>>, %arg4: memref<32x16xbf16, #tpu.memory_space<vmem>>, %arg5: memref<32x16xbf16, #tpu.memory_space<vmem>>, %arg6: memref<1x8x16xbf16, #tpu.memory_space<vmem>>, %arg7: memref<1x8x16xbf16, #tpu.memory_space<vmem>>) attributes {dimension_semantics = [#tpu.dimension_semantics<parallel>, #tpu.dimension_semantics<parallel>], iteration_bounds = array<i64: 2, 2>, scalar_prefetch = 0 : i64, scratch_operands = 0 : i64, tpu.core_type = #tpu.core_type<tc>, window_params = [{transform_indices = @transform_0, window_bounds = array<i64: 1, 8, 32>}, {transform_indices = @transform_1, window_bounds = array<i64: 1, 8, 32>}, {pipeline_mode = #tpu.pipeline_mode<synchronous>, transform_indices = @transform_2, window_bounds = array<i64: 32, 16>}, {pipeline_mode = #tpu.pipeline_mode<synchronous>, transform_indices = @transform_3, window_bounds = array<i64: 32, 16>}, {transform_indices = @transform_4, window_bounds = array<i64: 1, 8, 16>}, {transform_indices = @transform_5, window_bounds = array<i64: 1, 8, 16>}]} {
    %c0 = arith.constant 0 : index
    %c0_0 = arith.constant 0 : index
    %c0_1 = arith.constant 0 : index
    %0 = vector.load %arg2[%c0, %c0_0, %c0_1] : memref<1x8x32xbf16, #tpu.memory_space<vmem>>, vector<1x8x32xbf16>
    %1 = vector.shape_cast %0 : vector<1x8x32xbf16> to vector<8x32xbf16>
    %c0_2 = arith.constant 0 : index
    %c0_3 = arith.constant 0 : index
    %2 = vector.load %arg4[%c0_2, %c0_3] : memref<32x16xbf16, #tpu.memory_space<vmem>>, vector<32x16xbf16>
    %cst = arith.constant dense<0.000000e+00> : vector<8x16xf32>
    %3 = tpu.matmul %1, %2, %cst {dimension_numbers = #tpu.dot_dimension_numbers<[1], [0], [0], [1], [0, 0, 1, 1], [], []>} : vector<8x32xbf16>, vector<32x16xbf16>, vector<8x16xf32> -> vector<8x16xf32>
    %4 = arith.truncf %3 : vector<8x16xf32> to vector<8x16xbf16>
    %c0_4 = arith.constant 0 : index
    %c0_5 = arith.constant 0 : index
    %c0_6 = arith.constant 0 : index
    %5 = vector.load %arg6[%c0_4, %c0_5, %c0_6] : memref<1x8x16xbf16, #tpu.memory_space<vmem>>, vector<1x8x16xbf16>
    %6 = vector.shape_cast %5 : vector<1x8x16xbf16> to vector<8x16xbf16>
    %7 = vector.shape_cast %4 : vector<8x16xbf16> to vector<1x8x16xbf16>
    tpu.vector_store %arg6[%c0_4, %c0_5, %c0_6], %7 {strides = array<i32>} : memref<1x8x16xbf16, #tpu.memory_space<vmem>>, vector<1x8x16xbf16>,
    %c0_7 = arith.constant 0 : index
    %c0_8 = arith.constant 0 : index
    %c0_9 = arith.constant 0 : index
    %8 = vector.load %arg3[%c0_7, %c0_8, %c0_9] : memref<1x8x32xbf16, #tpu.memory_space<vmem>>, vector<1x8x32xbf16>
    %9 = vector.shape_cast %8 : vector<1x8x32xbf16> to vector<8x32xbf16>
    %c0_10 = arith.constant 0 : index
    %c0_11 = arith.constant 0 : index
    %10 = vector.load %arg5[%c0_10, %c0_11] : memref<32x16xbf16, #tpu.memory_space<vmem>>, vector<32x16xbf16>
    %cst_12 = arith.constant dense<0.000000e+00> : vector<8x16xf32>
    %11 = tpu.matmul %9, %10, %cst_12 {dimension_numbers = #tpu.dot_dimension_numbers<[1], [0], [0], [1], [0, 0, 1, 1], [], []>} : vector<8x32xbf16>, vector<32x16xbf16>, vector<8x16xf32> -> vector<8x16xf32>
    %12 = arith.truncf %11 : vector<8x16xf32> to vector<8x16xbf16>
    %c0_13 = arith.constant 0 : index
    %c0_14 = arith.constant 0 : index
    %c0_15 = arith.constant 0 : index
    %13 = vector.load %arg7[%c0_13, %c0_14, %c0_15] : memref<1x8x16xbf16, #tpu.memory_space<vmem>>, vector<1x8x16xbf16>
    %14 = vector.shape_cast %13 : vector<1x8x16xbf16> to vector<8x16xbf16>
    %15 = vector.shape_cast %12 : vector<8x16xbf16> to vector<1x8x16xbf16>
    tpu.vector_store %arg7[%c0_13, %c0_14, %c0_15], %15 {strides = array<i32>} : memref<1x8x16xbf16, #tpu.memory_space<vmem>>, vector<1x8x16xbf16>,
    return
  }
  func.func @transform_0(%arg0: i32, %arg1: i32) -> (i32, i32, i32) {
    %c0_i32 = arith.constant 0 : i32
    %c0_i32_0 = arith.constant 0 : i32
    return %arg0, %arg1, %c0_i32 : i32, i32, i32
  }
  func.func @transform_1(%arg0: i32, %arg1: i32) -> (i32, i32, i32) {
    %c0_i32 = arith.constant 0 : i32
    %c0_i32_0 = arith.constant 0 : i32
    return %arg0, %arg1, %c0_i32 : i32, i32, i32
  }
  func.func @transform_2(%arg0: i32, %arg1: i32) -> (i32, i32) {
    %c0_i32 = arith.constant 0 : i32
    %c0_i32_0 = arith.constant 0 : i32
    %c0_i32_1 = arith.constant 0 : i32
    return %c0_i32, %c0_i32_0 : i32, i32
  }
  func.func @transform_3(%arg0: i32, %arg1: i32) -> (i32, i32) {
    %c0_i32 = arith.constant 0 : i32
    %c0_i32_0 = arith.constant 0 : i32
    %c0_i32_1 = arith.constant 0 : i32
    return %c0_i32, %c0_i32_0 : i32, i32
  }
  func.func @transform_4(%arg0: i32, %arg1: i32) -> (i32, i32, i32) {
    %c0_i32 = arith.constant 0 : i32
    %c0_i32_0 = arith.constant 0 : i32
    return %arg0, %arg1, %c0_i32 : i32, i32, i32
  }
  func.func @transform_5(%arg0: i32, %arg1: i32) -> (i32, i32, i32) {
    %c0_i32 = arith.constant 0 : i32
    %c0_i32_0 = arith.constant 0 : i32
    return %arg0, %arg1, %c0_i32 : i32, i32, i32
  }
}

</mosaic_0001>

<bundles_post_ra>
// kernel: tpu_custom_call.1
= control target key start
LH: loop header
LB: loop body
LE: loop exit
PB: predicated region body
PF: predicated region fallthrough
CT: control target
= control target key end

     0   :  { %s1061_s0 = inlined_call_operand.vmem [shape: bf16[2,16,32], index: 0, kind: input, shape index: {}]   ;;  %s1062_s1 = inlined_call_operand.vmem [shape: bf16[2,16,32], index: 1, kind: input, shape index: {}]   ;;  %s1063_s2 = inlined_call_operand.vmem [shape: bf16[32,16], index: 2, kind: input, shape index: {}]   ;;  %s1064_s3 = inlined_call_operand.vmem [shape: bf16[32,16], index: 3, kind: input, shape index: {}]   ;;  %s1065_s4 = inlined_call_operand.hbm [shape: bf16[2,16,16], index: 4, kind: output, shape index: {0}]   ;;  %s1066_s5 = inlined_call_operand.hbm [shape: bf16[2,16,16], index: 5, kind: output, shape index: {1}]  }
   0x1   :  { %1068 = sst [smem:[#allocation9_spill]] %s1063_s2 }
   0x2   :  { %1069 = sst [smem:[#allocation10_spill]] %s1064_s3 }
   0x3   :  { %11 = vsyncpa [#allocation3], 0 }
   0x4   :  { %13 = vsyncpa [#allocation3 + $0x1], 0 }
   0x5   :  { %14 = vsyncpa [#allocation5], 0 }
   0x6   :  { %16 = vsyncpa [#allocation5 + $0x1], 0  ;;  %s876_s18 = smov 0   ;;  %s878_s19 = smov 0  }
   0x7   :  { %s880_s20 = smov 0   ;;  %s882_s21 = smov 0  }
   0x8   :  { %s884_s22 = smov 0   ;;  %s886_s23 = smov 0  }
   0x9   :  { %s888_s24 = smov 0   ;;  %s890_s25 = smov 0  }
   0xa LB: > { %s585_s26 = sadd.s32 4294967295, %s840_s25   ;;  %s586_s27 = sadd.s32 4294967294, %s840_s25   ;;  %s840_s25 = sphi %s890_s25, %s22_s25   ;;  %s836_s24 = sphi %s888_s24, %s1082_s24   ;;  %s832_s23 = sphi %s886_s23, %s1081_s23   ;;  %s828_s22 = sphi %s884_s22, %s1080_s22   ;;  %s824_s21 = sphi %s882_s21, %s1079_s21   ;;  %s820_s20 = sphi %s880_s20, %s1078_s20   ;;  %s816_s19 = sphi %s878_s19, %s1077_s19   ;;  %s812_s18 = sphi %s876_s18, %s1076_s18  }
   0xb   : > { %s31_s28 = sadd.s32 1, %s832_s23  ;;  %s34_s29 = sadd.s32 1, %s836_s24 }
   0xc   : > { %p32_p0 = scmp.ge.s32.totalorder %s31_s28, 2  ;;  %p151_p1 = scmp.ne.s32.totalorder %s820_s20, %s816_s19 }
   0xd   : > { %p152_p2 = scmp.eq.s32.totalorder %s585_s26, 3  ;;  %p157_p5 = scmp.ne.s32.totalorder %s816_s19, %s812_s18 }
   0xe   : > { %s1084_s28 = smov (%p32_p0, %s31_s28), 0  ;;  %s1086_s29 = smov (!%p32_p0, %s34_s29), %s836_s24 }
   0xf   : > { %s137_s30 = ssub.s32 %s832_s23, %s1084_s28  ;;  %p927_p3 = por %p152_p2, %p151_p1 }
  0x10   : > { %p36_p4 = scmp.ge.s32.totalorder %s1086_s29, 2  ;;  %p158_p6 = scmp.eq.s32.totalorder %s586_s27, 3 }
  0x11   : > { %p589_p7 = scmp.ge.s32.totalorder %s840_s25, 1  ;;  %p232_p9 = scmp.lt.s32.totalorder %s840_s25, 5 }
  0x12   : > { %s1088_s29 = smov (%p36_p4, %s1086_s29), 0  ;;  %p936_p8 = por %p158_p6, %p157_p5 }
  0x13   : > { %1071 = sst [smem:[#allocation8_spill]] %s1088_s29  ;;  %s136_s8 = ssub.s32 %s836_s24, %s1088_s29 }
  0x14   : > { %s141_s9 = sadd.s32 1, %s820_s20  ;;  %s138_s10 = sor.u32 %s137_s30, %s136_s8 }
  0x15   : > { %p233_p10 = pnand %p589_p7, %p232_p9  ;;  %p139_p11 = scmp.eq.s32.totalorder %s138_s10, 0 }
  0x16   : > { %s1073_s2 = sld [smem:[#allocation9_spill]] (!%p233_p10)  ;;  %v842_v1 = vmov (!%p233_p10), 0.0   ;;  %s1074_s3 = sld [smem:[#allocation10_spill]] (!%p233_p10)  ;;  %vm843_vm0 = vmmov (!%p233_p10), 0   ;;  %vm310_vm1 = vcmask (!%p233_p10), 261120   ;;  %vm355_vm2 = vcmask (!%p233_p10), 125952  }
  0x17   : > { %s945_s11 = scalar_select %p139_p11, %s820_s20, %s141_s9  }
  0x18   : > { %236 = sbr.rel (%p233_p10) target bundleno = 290 (0x122), region = 36  ;;  %616 = vmatprep.subr.bf16.mxu0 (!%p233_p10), %v842_v1  ;;  %624 = vmatprep.subr.bf16.mxu1 (!%p233_p10), %v842_v1  ;;  %p276_p12 = scmp.lt.s32.totalorder (!%p233_p10), %s828_s22, 1 }
  0x19   : > { %620 = vmatprep.mubr.msk.bf16.mxu0 (!%p233_p10), %vm843_vm0, %v842_v1  ;;  %p278_p13 = scmp.lt.s32.totalorder (!%p233_p10), %s824_s21, 1  ;;  %628 = vmatprep.mubr.msk.bf16.mxu1 (!%p233_p10), %vm843_vm0, %v842_v1  ;;  %s970_s27 = sand.u32 (!%p233_p10), 1, %s816_s19  }
  0x1a   : > { %s420_s16 = scalar_lea.sflag (!%p233_p10), [#allocation3], %s970_s27 }
  0x1c   : > { %v710_v0 = vld [vmem:[%s1073_s2] sm:$0xff] (!%p233_p10)   ;;  %v712_v3 = vld [vmem:[%s1073_s2 + $0x8] sm:$0xff] (!%p233_p10)   ;;  %s590_s2 = sshll.u32 (!%p233_p10), %s970_s27, 2 }
  0x1d   : > { %v711_v2 = vld [vmem:[%s1074_s3] sm:$0xff] (!%p233_p10)   ;;  %617 = vmatpush3.bf16.msra.mxu0 (!%p233_p10), %v710_v0  ;;  %v713_v4 = vld [vmem:[%s1074_s3 + $0x8] sm:$0xff] (!%p233_p10)   ;;  %s275_s29 = scalar_lea.vmem (!%p233_p10), [#allocation4], %s590_s2 }
  0x1e   : > { %625 = vmatpush3.bf16.msra.mxu1 (!%p233_p10), %v711_v2  ;;  %618 = vmatprep.subr.bf16.mxu0 (!%p233_p10), %v842_v1  ;;  %s455_s13 = sshll.u32 (!%p233_p10), %s275_s29, 4  ;;  %s987_s13 = int_to_ptr.vmem [resolvable:$true] %s455_s13 }
  0x1f   : > { %626 = vmatprep.subr.bf16.mxu1 %v842_v1  ;;  %s277_s30 = scalar_select %p276_p12, %s828_s22, 1 }
  0x20   : > { %s279_s8 = scalar_select %p278_p13, %s824_s21, 1 }
  0x21   : > { %619 = vmatpush3.bf16.msra.mxu0 %v712_v3  ;;  %s592_s9 = sshll.u32 %s277_s30, 1  ;;  %s604_s30 = sshll.u32 %s828_s22, 1 }
  0x22   : > { %627 = vmatpush3.bf16.msra.mxu1 %v713_v4  ;;  %s281_s10 = sadd.s32 %s592_s9, %s279_s8  ;;  %s436_s8 = sadd.s32 %s824_s21, %s604_s30 }
  0x23   : > { %s593_s12 = sshll.u32 %s281_s10, 2  ;;  %s605_s9 = sshll.u32 %s436_s8, 6 }
  0x24   : > { %s283_s15 = scalar_lea.vmem %s1061_s0, %s593_s12  ;;  %s291_s26 = scalar_lea.vmem %s1062_s1, %s593_s12 }
  0x25   : > { %v293_v5 = vld [vmem:[%s283_s15] sm:$0xf]  ;;  %s268_s10 = scalar_lea.vmem [#allocation2], %s590_s2  ;;  %s978_s15 = scalar_lea.hbm %s1065_s4, %s605_s9 }
  0x26   : > { %v357_v6 = vld [vmem:[%s291_s26] sm:$0xf]  ;;  %621 = vmatmul.mubr.msk.bf16.vlgmr.msra.gmra.mrb[0].mxu0 %vm310_vm1, %v293_v5  ;;  %s440_s3 = sshll.u32 %s268_s10, 4  ;;  %s985_s22 = scalar_lea.hbm %s1066_s5, %s605_s9  ;;  %s980_s3 = int_to_ptr.vmem [resolvable:$true] %s440_s3 }
  0x27   : > { %629 = vmatmul.mubr.msk.bf16.vlgmr.msra.gmra.mrb[0].mxu1 %vm310_vm1, %v357_v6  ;;  %s714_s17 = scalar_lea.vmem %s980_s3, 64  ;;  %s844_s26 = smov [#allocation2]  }
  0x28   : > { %p715_p0 = scmp.ne.s32.totalorder %s980_s3, %s714_s17  ;;  %s718_s30 = sshll.u32 %s844_s26, 4  ;;  %s719_s30 = int_to_ptr.vmem [resolvable:$false] %s718_s30 }
  0x29   : > { %s720_s8 = scalar_lea.vmem %s719_s30, 128  ;;  %p721_p4 = scmp.lt.s32.totalorder %s980_s3, %s719_s30 }
  0x2a   : > { %p716_p1 = pnand %p715_p0, %p927_p3  ;;  %p722_p5 = scmp.lt.s32.totalorder %s720_s8, %s714_s17 }
  0x2c   : > { %p717_p2 = pneg %p716_p1  ;;  %p723_p6 = por %p722_p5, %p721_p4 }
  0x2e   : > { %p724_p7 = pnand %p723_p6, %p717_p2 }
  0xf9   : > { %v348_v7 = vpop.f32.mrb[0].mxu0 }
  0xfa   : > { %v411_v8 = vpop.f32.mrb[0].mxu1  ;;  %v354_v9 = vpack.c.bf16 %v348_v7, %v348_v7  ;;  %v622_v11 = vpop.f32.mrb[1].mxu0 }
  0xfb   : > { %v417_v10 = vpack.c.bf16 %v411_v8, %v411_v8  ;;  %v630_v12 = vpop.f32.mrb[1].mxu1  ;;  %v351_v13 = vpop.f32.mrb[2].mxu0 }
  0xfc   : > { %v414_v14 = vpop.f32.mrb[2].mxu1  ;;  %v623_v15 = vpop.f32.mrb[3].mxu0  ;;  %356 = vst.msk [vmem:[%s268_s10] sm:$0xf] %vm355_vm2, %v354_v9 }
  0xfd   : > { %v631_v16 = vpop.f32.mrb[3].mxu1  ;;  %418 = vst.msk [vmem:[%s275_s29] sm:$0xf] %vm355_vm2, %v417_v10 }
  0xfe   : > { %727 = shalt.err (!%p724_p7)
}
  0xff   : > { %s728_s29 = scalar_lea.hbm %s978_s15, 64  ;;  %s732_s12 = scalar_lea.hbm %s1065_s4, 256 }
 0x100   : > { %p729_p9 = scmp.ne.s32.totalorder %s978_s15, %s728_s29  ;;  %p733_p12 = scmp.lt.u32.totalorder %s978_s15, %s1065_s4 }
 0x101   : > { %p734_p13 = scmp.lt.u32.totalorder %s732_s12, %s728_s29  ;;  %p736_p1 = scmp.lt.u32.totalorder %s728_s29, %s978_s15 }
 0x102   : > { %p730_p10 = pnand %p729_p9, %p927_p3 }
 0x103   : > { %p735_p0 = por %p734_p13, %p733_p12 }
 0x104   : > { %p731_p11 = pneg %p730_p10 }
 0x105   : > { %p737_p2 = por %p736_p1, %p735_p0 }
 0x107   : > { %p738_p4 = pnand %p737_p2, %p731_p11 }
 0x109   : > { %741 = shalt.err (!%p738_p4)
}
 0x10a   : > { %632 = dma.vmem_to_hbm [thread:$0]  (%p927_p3), %s980_s3, 64, %s978_s15, %s420_s16  }
 0x10b   : > { %s425_s21 = scalar_lea.sflag [#allocation5], %s970_s27  ;;  %s742_s17 = scalar_lea.vmem %s987_s13, 64 }
 0x10c   : > { %p743_p5 = scmp.ne.s32.totalorder %s987_s13, %s742_s17  ;;  %s845_s26 = smov [#allocation4]  }
 0x10d   : > { %s746_s30 = sshll.u32 %s845_s26, 4  ;;  %s747_s30 = int_to_ptr.vmem [resolvable:$false] %s746_s30 }
 0x10e   : > { %p744_p6 = pnand %p743_p5, %p927_p3  ;;  %s748_s8 = scalar_lea.vmem %s747_s30, 128 }
 0x10f   : > { %p749_p9 = scmp.lt.s32.totalorder %s987_s13, %s747_s30  ;;  %p750_p10 = scmp.lt.s32.totalorder %s748_s8, %s742_s17 }
 0x110   : > { %p745_p7 = pneg %p744_p6 }
 0x111   : > { %p751_p11 = por %p750_p10, %p749_p9 }
 0x113   : > { %p752_p12 = pnand %p751_p11, %p745_p7 }
 0x115   : > { %755 = shalt.err (!%p752_p12)
}
 0x116   : > { %s756_s3 = scalar_lea.hbm %s985_s22, 64  ;;  %s760_s16 = scalar_lea.hbm %s1066_s5, 256 }
 0x117   : > { %p757_p13 = scmp.ne.s32.totalorder %s985_s22, %s756_s3  ;;  %p761_p2 = scmp.lt.u32.totalorder %s985_s22, %s1066_s5 }
 0x118   : > { %p762_p4 = scmp.lt.u32.totalorder %s760_s16, %s756_s3  ;;  %p764_p6 = scmp.lt.u32.totalorder %s756_s3, %s985_s22 }
 0x119   : > { %p758_p0 = pnand %p757_p13, %p927_p3 }
 0x11a   : > { %p763_p5 = por %p762_p4, %p761_p2 }
 0x11b   : > { %p759_p1 = pneg %p758_p0 }
 0x11c   : > { %p765_p7 = por %p764_p6, %p763_p5 }
 0x11e   : > { %p766_p9 = pnand %p765_p7, %p759_p1 }
 0x120   : > { %769 = shalt.err (!%p766_p9)
}
 0x121   : > { %633 = dma.vmem_to_hbm [thread:$0]  (%p927_p3), %s987_s13, 64, %s985_s22, %s425_s21  }
 0x122 PF: > { %p643_p10 = scmp.ge.s32.totalorder %s840_s25, 2  ;;  %s467_s10 = sand.u32 1, %s812_s18  }
 0x123   : > { %s468_s12 = scalar_lea.sflag [#allocation3], %s467_s10 }
 0x124   : > { %p637_p11 = pnand %p643_p10, %p936_p8 }
 0x126   : > { %803 = dma.done.wait (!%p637_p11), %s468_s12, 64  }
 0x127   : > { %805 = vsyncadd (!%p637_p11), %s468_s12, 4294967232  ;;  %s477_s14 = scalar_lea.sflag [#allocation5], %s467_s10 }
 0x128   : > { %807 = dma.done.wait (!%p637_p11), %s477_s14, 64  }
 0x129   : > { %809 = vsyncadd (!%p637_p11), %s477_s14, 4294967232  ;;  %s22_s25 = sadd.s32 1, %s840_s25   ;;  %s1075_s6 = sld [smem:[#allocation8_spill]] }
 0x12a   : > { %p19_p12 = scmp.ge.s32.totalorder %s22_s25, 6   ;;  %s1076_s18 = smov %s816_s19 }
 0x12b   : > { %s1077_s19 = smov %s820_s20  ;;  %s1078_s20 = smov %s945_s11 }
 0x12c   : > { %s1079_s21 = smov %s832_s23  ;;  %s1080_s22 = smov %s836_s24 }
 0x12d   : > { %s1081_s23 = smov %s1084_s28  ;;  %21 = sbr.rel (!%p19_p12) target bundleno = 10 (0xa), region = 91 }
 0x12f   : > { %s1082_s24 = smov %s1075_s6 }
 0x134   :  { %482 = vsyncpa [#allocation3], 1 }
 0x135   :  { %484 = vsyncpa [#allocation3 + $0x1], 1 }
 0x136   :  { %485 = vsyncpa [#allocation5], 1 }
 0x137   :  { %487 = vsyncpa [#allocation5 + $0x1], 1 }

</bundles_post_ra>
